<compile_context>
chip_gen: v7x
topology: tpu7x:2x2x1
jax: 0.10.0
libtpu: 0.0.40
codegen_flags: <defaults>
</compile_context>

<pallas_src>
import jax
import jax.numpy as jnp
from jax.experimental import pallas as pl
from jax.experimental.pallas import tpu as pltpu


# ----------------------------------------------------------------------------
# helpers
# ----------------------------------------------------------------------------
def _round_up(x, m):
    return ((x + m - 1) // m) * m


def _pick_row_tile(n, pref):
    """Tile along a sublane (second-to-last) axis: multiple of 8.

    When the axis is large enough, keep at least 2 blocks so a 'parallel'
    grid dimension can be sharded across both v7x TensorCores.
    """
    if n >= 2 * pref:
        return pref, _round_up(n, pref)
    if n >= 64:
        t = _round_up(-(-n // 2), 8)
        return t, 2 * t
    t = max(8, _round_up(n, 8))
    return t, t


def _pick_lane_tile(n, pref):
    """Tile along a lane (last) axis: multiple of 128, pads n up to it."""
    if n >= pref:
        return pref, _round_up(n, pref)
    t = _round_up(n, 128)
    return t, t


def _pad2(x, rows, cols):
    return jnp.pad(x, ((0, rows - x.shape[0]), (0, cols - x.shape[1])))


def _leaky_relu(x, slope=0.01):
    return jnp.where(x > 0, x, slope * x)


# ----------------------------------------------------------------------------
# Generic tiled matmul (bf16 MXU, f32 accumulate).  Used for the hoisted
# grid-invariant products: proj = neigh_feat @ W_agg and UQ = uidfeat @ Q.
# ----------------------------------------------------------------------------
def _mm_kernel(a_ref, b_ref, o_ref, acc_ref):
    @pl.when(pl.program_id(2) == 0)
    def _():
        acc_ref[...] = jnp.zeros_like(acc_ref)

    acc_ref[...] += jnp.dot(a_ref[...], b_ref[...],
                            preferred_element_type=jnp.float32)

    @pl.when(pl.program_id(2) == pl.num_programs(2) - 1)
    def _():
        o_ref[...] = acc_ref[...].astype(o_ref.dtype)


def matmul(a, b, *, out_dtype=jnp.float32,
           tm_pref=256, tn_pref=256, tk_pref=512):
    m, k = a.shape
    _, n = b.shape
    tm, m_p = _pick_row_tile(m, tm_pref)
    tn, n_p = _pick_lane_tile(n, tn_pref)
    tk, k_p = _pick_lane_tile(k, tk_pref)

    bf = jnp.bfloat16
    a_pad = _pad2(a, m_p, k_p).astype(bf)
    b_pad = _pad2(b, k_p, n_p).astype(bf)

    out = pl.pallas_call(
        _mm_kernel,
        out_shape=jax.ShapeDtypeStruct((m_p, n_p), out_dtype),
        grid=(m_p // tm, n_p // tn, k_p // tk),
        in_specs=[pl.BlockSpec((tm, tk), lambda i, j, kk: (i, kk)),
                  pl.BlockSpec((tk, tn), lambda i, j, kk: (kk, j))],
        out_specs=pl.BlockSpec((tm, tn), lambda i, j, kk: (i, j)),
        scratch_shapes=[pltpu.VMEM((tm, tn), jnp.float32)],
        compiler_params=pltpu.CompilerParams(
            dimension_semantics=("parallel", "parallel", "arbitrary"),
            vmem_limit_bytes=32 * 1024 * 1024),
    )(a_pad, b_pad)
    return out[:m, :n]


# ----------------------------------------------------------------------------
# Encoder: GraphSage-style bipartite layer.
# TODO(synk): the original GraphSageLayer (per-rating weight banks, agg_accum,
# share_param, dropout) is not provided; a mean-aggregation bipartite GraphSAGE
# layer with leaky_relu activation is implemented instead (dropout = identity
# at inference).
#   proj  = neigh_feat @ W_agg          (hoisted, computed once)
#   agg   = (A_mask @ proj) * (1/deg)   (k-loop accumulation, scale in epilogue)
#   h     = leaky_relu(self_feat @ W_self + agg)
#   out   = h @ W_out
# Grid: (dst tiles) x (src reduction tiles); f32 VMEM accumulator with
# init/finalize via pl.when; weights and per-i tiles stay resident.
# ----------------------------------------------------------------------------
def sage_layer_kernel(adj_ref, proj_ref, self_ref, scale_ref,
                      w_self_ref, w_out_ref, out_ref, acc_ref):
    k = pl.program_id(1)

    @pl.when(k == 0)
    def _():
        acc_ref[...] = jnp.zeros_like(acc_ref)

    # dominant k-loop: exact 0/1 mask @ pre-projected neighbor features
    acc_ref[...] += jnp.dot(adj_ref[...], proj_ref[...],
                            preferred_element_type=jnp.float32)

    @pl.when(k == pl.num_programs(1) - 1)
    def _():
        self_term = jnp.dot(self_ref[...], w_self_ref[...],
                            preferred_element_type=jnp.float32)
        h = _leaky_relu(self_term + acc_ref[...] * scale_ref[...])
        out_ref[...] = jnp.dot(h.astype(jnp.bfloat16), w_out_ref[...],
                               preferred_element_type=jnp.float32
                               ).astype(out_ref.dtype)


def sage_layer(adj_mask, inv_deg, self_feat, neigh_feat,
               w_self, w_agg, w_out, *, tm_pref=512, tk_pref=1024):
    n_dst, n_src = adj_mask.shape
    fd = self_feat.shape[1]
    agg_units = w_agg.shape[1]
    out_units = w_out.shape[1]

    # Hoisted neighbor projection: grid-invariant, computed exactly once.
    proj = matmul(neigh_feat, w_agg, out_dtype=jnp.bfloat16)  # [n_src, agg]

    tm, nd_p = _pick_row_tile(n_dst, tm_pref)
    tk, ns_p = _pick_lane_tile(n_src, tk_pref)
    fd_p = _round_up(fd, 128)
    a_p = _round_up(agg_units, 128)
    o_p = _round_up(out_units, 128)
    # TODO(synk): pad a_p/o_p to 256 on v6e/v7x (256-wide MXU) when units>=128.

    bf = jnp.bfloat16
    # TODO(synk): 1-byte adjacency (int8 on v5e/v6e, fp8 on v7x) would halve
    # the dominant HBM stream; bf16 0/1 kept here for portability (exact).
    adj_p = _pad2(adj_mask, nd_p, ns_p).astype(bf)
    proj_p = _pad2(proj, ns_p, a_p)                      # already bf16
    self_p = _pad2(self_feat, nd_p, fd_p).astype(bf)
    scale_p = jnp.pad(inv_deg.astype(jnp.float32).reshape(-1, 1),
                      ((0, nd_p - n_dst), (0, 0)))
    ws_p = _pad2(w_self, fd_p, a_p).astype(bf)
    wo_p = _pad2(w_out, a_p, o_p).astype(bf)

    grid = (nd_p // tm, ns_p // tk)
    out_p = pl.pallas_call(
        sage_layer_kernel,
        out_shape=jax.ShapeDtypeStruct((nd_p, o_p), jnp.float32),
        grid=grid,
        in_specs=[
            pl.BlockSpec((tm, tk), lambda i, k: (i, k)),     # 0/1 adjacency mask
            pl.BlockSpec((tk, a_p), lambda i, k: (k, 0)),    # hoisted projection
            pl.BlockSpec((tm, fd_p), lambda i, k: (i, 0)),   # self feats (per-i resident)
            pl.BlockSpec((tm, 1), lambda i, k: (i, 0)),      # 1/deg row scale
            pl.BlockSpec((fd_p, a_p), lambda i, k: (0, 0)),  # W_self (resident)
            pl.BlockSpec((a_p, o_p), lambda i, k: (0, 0)),   # W_out  (resident)
        ],
        out_specs=pl.BlockSpec((tm, o_p), lambda i, k: (i, 0)),
        scratch_shapes=[pltpu.VMEM((tm, a_p), jnp.float32)],
        compiler_params=pltpu.CompilerParams(
            dimension_semantics=("parallel", "arbitrary"),
            vmem_limit_bytes=32 * 1024 * 1024,
        ),
    )(adj_p, proj_p, self_p, scale_p, ws_p, wo_p)
    return out_p[:n_dst, :out_units]


# ----------------------------------------------------------------------------
# Decoder: DotProduct.forward == dgl fn.u_dot_v('h','h','sr').
# Edge-index gather is wrapper glue (jnp.take); the per-edge reduction runs in
# Pallas with a lane-dense [blocks, 128] output and NO feature-dim padding
# (full-extent last block dim).
# TODO(synk): the gather could be fused via PrefetchScalarGridSpec + pl.Element
# row indexing to avoid materializing u_g/i_g in HBM.
# ----------------------------------------------------------------------------
def edge_dot_kernel(u_ref, v_ref, out_ref):
    out_ref[...] = jnp.sum(u_ref[...] * v_ref[...], axis=-1)


def edge_dot(u_g, i_g, *, gb_pref=64):
    e, d = u_g.shape
    r = -(-e // 128)                         # rows of 128 edges
    gb = min(gb_pref, _round_up(r, 8))       # rows-of-128 per grid step
    g = _round_up(r, gb)
    e_p = g * 128
    u_p = jnp.pad(u_g, ((0, e_p - e), (0, 0))).reshape(g, 128, d)
    i_p = jnp.pad(i_g, ((0, e_p - e), (0, 0))).reshape(g, 128, d)

    out = pl.pallas_call(
        edge_dot_kernel,
        out_shape=jax.ShapeDtypeStruct((g, 128), jnp.float32),
        grid=(g // gb,),
        in_specs=[pl.BlockSpec((gb, 128, d), lambda b: (b, 0, 0)),
                  pl.BlockSpec((gb, 128, d), lambda b: (b, 0, 0))],
        out_specs=pl.BlockSpec((gb, 128), lambda b: (b, 0)),
        compiler_params=pltpu.CompilerParams(
            dimension_semantics=("parallel",)),
    )(u_p, i_p)
    return out.reshape(e_p, 1)[:e]


# ----------------------------------------------------------------------------
# DotProduct.inference: uidfeat @ Q @ ifeat.T.
# UQ = uidfeat @ Q is hoisted (grid-invariant over item tiles); ifeat is
# pre-transposed in the wrapper so the kernel is a single plain [K,N] matmul
# with a lane-dense N output.
# ----------------------------------------------------------------------------
def bilinear_kernel(uq_ref, it_ref, out_ref):
    out_ref[...] = jnp.dot(uq_ref[...], it_ref[...],
                           preferred_element_type=jnp.float32
                           ).astype(out_ref.dtype)


def dot_product_inference(uidfeat, q, ifeat, *, tm_pref=256, tn_pref=512):
    n_u, d = uidfeat.shape
    n_i = ifeat.shape[0]

    uq = matmul(uidfeat, q, out_dtype=jnp.bfloat16)      # hoisted U @ Q

    d_p = _round_up(d, 128)
    tm, nu_p = _pick_row_tile(n_u, tm_pref)
    tn, ni_p = _pick_lane_tile(n_i, tn_pref)

    bf = jnp.bfloat16
    uq_p = _pad2(uq, nu_p, d_p)                          # already bf16
    it_p = _pad2(ifeat.T, d_p, ni_p).astype(bf)          # pre-transposed [K, N]

    out = pl.pallas_call(
        bilinear_kernel,
        out_shape=jax.ShapeDtypeStruct((nu_p, ni_p), jnp.float32),
        grid=(nu_p // tm, ni_p // tn),
        in_specs=[pl.BlockSpec((tm, d_p), lambda i, j: (i, 0)),
                  pl.BlockSpec((d_p, tn), lambda i, j: (0, j))],
        out_specs=pl.BlockSpec((tm, tn), lambda i, j: (i, j)),
        compiler_params=pltpu.CompilerParams(
            dimension_semantics=("parallel", "parallel"),
            vmem_limit_bytes=32 * 1024 * 1024,
        ),
    )(uq_p, it_p)
    return out[:n_u, :n_i]


# ----------------------------------------------------------------------------
# Net: encoder -> decoder
# ----------------------------------------------------------------------------
def init_params(key, src_in_units, dst_in_units, agg_units, out_units):
    ks = jax.random.split(key, 7)
    return {
        # user-side encoder weights
        "w_self_u": jax.random.normal(ks[0], (src_in_units, agg_units), jnp.float32) * 0.1,
        "w_agg_u":  jax.random.normal(ks[1], (dst_in_units, agg_units), jnp.float32) * 0.1,
        "w_out_u":  jax.random.normal(ks[2], (agg_units, out_units), jnp.float32) * 0.1,
        # item-side encoder weights
        "w_self_i": jax.random.normal(ks[3], (dst_in_units, agg_units), jnp.float32) * 0.1,
        "w_agg_i":  jax.random.normal(ks[4], (src_in_units, agg_units), jnp.float32) * 0.1,
        "w_out_i":  jax.random.normal(ks[5], (agg_units, out_units), jnp.float32) * 0.1,
        # decoder parameter: DotProduct Q (only used by inference()).
        "Q": jax.random.normal(ks[6], (out_units, out_units), jnp.float32),
    }


def net_forward(params, adj_mask, edge_src, edge_dst, ufeat, ifeat):
    # mean aggregation = 0/1 mask matmul + 1/deg row scale (exact decomposition)
    inv_deg_u = 1.0 / jnp.clip(adj_mask.sum(axis=1), 1.0, None)   # [n_users]
    inv_deg_i = 1.0 / jnp.clip(adj_mask.sum(axis=0), 1.0, None)   # [n_items]

    user_out = sage_layer(adj_mask, inv_deg_u, ufeat, ifeat,
                          params["w_self_u"], params["w_agg_u"], params["w_out_u"])
    item_out = sage_layer(adj_mask.T, inv_deg_i, ifeat, ufeat,
                          params["w_self_i"], params["w_agg_i"], params["w_out_i"])

    # decoder: per-edge u . v (gather is glue; reduction is lane-dense Pallas)
    u_g = jnp.take(user_out, edge_src, axis=0)
    i_g = jnp.take(item_out, edge_dst, axis=0)
    pred_ratings = edge_dot(u_g, i_g)                    # [num_edges, 1]
    return pred_ratings, user_out, item_out


if __name__ == "__main__":
    key = jax.random.PRNGKey(0)
    k_feat_u, k_feat_i, k_adj, k_edges, k_params = jax.random.split(key, 5)

    # small, deterministic synthetic shapes
    n_users, n_items = 8, 16
    src_in_units, dst_in_units = 16, 16     # args.src_in_units / args.dst_in_units
    gcn_agg_units, gcn_out_units = 32, 32   # args.gcn_agg_units / args.gcn_out_units
    n_edges = 24

    ufeat = jax.random.normal(k_feat_u, (n_users, src_in_units), jnp.float32)
    ifeat = jax.random.normal(k_feat_i, (n_items, dst_in_units), jnp.float32)

    # dense bipartite enc_graph adjacency mask (0/1)
    adj_mask = (jax.random.uniform(k_adj, (n_users, n_items)) < 0.4).astype(jnp.float32)

    # dec_graph edges (user -> item)
    edge_src = jax.random.randint(k_edges, (n_edges,), 0, n_users)
    edge_dst = jax.random.randint(jax.random.fold_in(k_edges, 1), (n_edges,), 0, n_items)

    params = init_params(k_params, src_in_units, dst_in_units,
                         gcn_agg_units, gcn_out_units)

    pred, user_out, item_out = net_forward(params, adj_mask,
                                           edge_src, edge_dst, ufeat, ifeat)
    # also exercise DotProduct.inference path (uses Q)
    scores = dot_product_inference(user_out, params["Q"], item_out)

    jax.block_until_ready((pred, user_out, item_out, scores))
    assert pred.shape == (n_edges, 1)
    assert user_out.shape == (n_users, gcn_out_units)
    assert item_out.shape == (n_items, gcn_out_units)
    assert scores.shape == (n_users, n_items)
    assert bool(jnp.all(jnp.isfinite(pred))) and bool(jnp.all(jnp.isfinite(scores)))
    print("KERNEL_OK")
</pallas_src>

<mosaic_0001>
module attributes {stable_mosaic.version = 11 : i64} {
  func.func @_mm_kernel(%arg0: i32, %arg1: i32, %arg2: i32, %arg3: memref<16x128xbf16, #tpu.memory_space<vmem>>, %arg4: memref<128x128xbf16, #tpu.memory_space<vmem>>, %arg5: memref<16x128xbf16, #tpu.memory_space<vmem>>, %arg6: memref<16x128xf32, #tpu.memory_space<vmem>>) attributes {dimension_semantics = [#tpu.dimension_semantics<parallel>, #tpu.dimension_semantics<parallel>, #tpu.dimension_semantics<arbitrary>], iteration_bounds = array<i64: 1, 1, 1>, scalar_prefetch = 0 : i64, scratch_operands = 1 : i64, tpu.core_type = #tpu.core_type<tc>, window_params = [{transform_indices = @transform_0, window_bounds = array<i64: 16, 128>}, {transform_indices = @transform_1, window_bounds = array<i64: 128, 128>}, {transform_indices = @transform_2, window_bounds = array<i64: 16, 128>}]} {
    %c0_i32 = arith.constant 0 : i32
    %0 = arith.cmpi eq, %arg2, %c0_i32 : i32
    %1 = arith.extui %0 : i1 to i32
    %c0_i32_0 = arith.constant 0 : i32
    %2 = arith.cmpi ne, %1, %c0_i32_0 : i32
    scf.if %2 {
      %cst_10 = arith.constant 0.000000e+00 : f32
      %12 = vector.broadcast %cst_10 : f32 to vector<16x128xf32>
      %c0_11 = arith.constant 0 : index
      %c0_12 = arith.constant 0 : index
      %13 = vector.load %arg6[%c0_11, %c0_12] : memref<16x128xf32, #tpu.memory_space<vmem>>, vector<16x128xf32>
      tpu.vector_store %arg6[%c0_11, %c0_12], %12 {strides = array<i32>} : memref<16x128xf32, #tpu.memory_space<vmem>>, vector<16x128xf32>,
    } else {
    }
    %c0 = arith.constant 0 : index
    %c0_1 = arith.constant 0 : index
    %3 = vector.load %arg6[%c0, %c0_1] : memref<16x128xf32, #tpu.memory_space<vmem>>, vector<16x128xf32>
    %c0_2 = arith.constant 0 : index
    %c0_3 = arith.constant 0 : index
    %4 = vector.load %arg3[%c0_2, %c0_3] : memref<16x128xbf16, #tpu.memory_space<vmem>>, vector<16x128xbf16>
    %c0_4 = arith.constant 0 : index
    %c0_5 = arith.constant 0 : index
    %5 = vector.load %arg4[%c0_4, %c0_5] : memref<128x128xbf16, #tpu.memory_space<vmem>>, vector<128x128xbf16>
    %cst = arith.constant dense<0.000000e+00> : vector<16x128xf32>
    %6 = tpu.matmul %4, %5, %cst {dimension_numbers = #tpu.dot_dimension_numbers<[1], [0], [0], [1], [0, 0, 1, 1], [], []>} : vector<16x128xbf16>, vector<128x128xbf16>, vector<16x128xf32> -> vector<16x128xf32>
    %7 = arith.addf %3, %6 : vector<16x128xf32>
    %c0_6 = arith.constant 0 : index
    %c0_7 = arith.constant 0 : index
    %8 = vector.load %arg6[%c0_6, %c0_7] : memref<16x128xf32, #tpu.memory_space<vmem>>, vector<16x128xf32>
    tpu.vector_store %arg6[%c0_6, %c0_7], %7 {strides = array<i32>} : memref<16x128xf32, #tpu.memory_space<vmem>>, vector<16x128xf32>,
    %c0_i32_8 = arith.constant 0 : i32
    %9 = arith.cmpi eq, %arg2, %c0_i32_8 : i32
    %10 = arith.extui %9 : i1 to i32
    %c0_i32_9 = arith.constant 0 : i32
    %11 = arith.cmpi ne, %10, %c0_i32_9 : i32
    scf.if %11 {
      %c0_10 = arith.constant 0 : index
      %c0_11 = arith.constant 0 : index
      %12 = vector.load %arg6[%c0_10, %c0_11] : memref<16x128xf32, #tpu.memory_space<vmem>>, vector<16x128xf32>
      %13 = arith.truncf %12 : vector<16x128xf32> to vector<16x128xbf16>
      %c0_12 = arith.constant 0 : index
      %c0_13 = arith.constant 0 : index
      %14 = vector.load %arg5[%c0_12, %c0_13] : memref<16x128xbf16, #tpu.memory_space<vmem>>, vector<16x128xbf16>
      tpu.vector_store %arg5[%c0_12, %c0_13], %13 {strides = array<i32>} : memref<16x128xbf16, #tpu.memory_space<vmem>>, vector<16x128xbf16>,
    } else {
    }
    return
  }
  func.func @transform_0(%arg0: i32, %arg1: i32, %arg2: i32) -> (i32, i32) {
    %c0_i32 = arith.constant 0 : i32
    return %arg0, %arg2 : i32, i32
  }
  func.func @transform_1(%arg0: i32, %arg1: i32, %arg2: i32) -> (i32, i32) {
    %c0_i32 = arith.constant 0 : i32
    return %arg2, %arg1 : i32, i32
  }
  func.func @transform_2(%arg0: i32, %arg1: i32, %arg2: i32) -> (i32, i32) {
    %c0_i32 = arith.constant 0 : i32
    return %arg0, %arg1 : i32, i32
  }
}

</mosaic_0001>

<bundles_post_ra>
// kernel: tpu_custom_call.1
= control target key start
LH: loop header
LB: loop body
LE: loop exit
PB: predicated region body
PF: predicated region fallthrough
CT: control target
= control target key end

     0   :  { %7 = vsyncpa [#allocation4], 0  ;;  %s401_s0 = inlined_call_operand.hbm [shape: bf16[16,128], index: 0, kind: input, shape index: {}]   ;;  %s402_s1 = inlined_call_operand.hbm [shape: bf16[128,128], index: 1, kind: input, shape index: {}]   ;;  %s403_s2 = inlined_call_operand.hbm [shape: bf16[16,128], index: 2, kind: output, shape index: {}]  }
   0x1   :  { %8 = vsyncpa [#allocation7], 0 }
   0x2   :  { %9 = vsyncpa [#allocation5], 0  ;;  %s334_s9 = smov [#allocation3]   ;;  %s262_s13 = scalar_lea.hbm %s401_s0, 128 }
   0x3   :  { %s15_s10 = sshll.u32 %s334_s9, 4  ;;  %p263_p0 = scmp.ne.s32.totalorder %s401_s0, %s262_s13  ;;  %s16_s10 = int_to_ptr.vmem [resolvable:$true] %s15_s10 }
   0x4   :  { %p266_p1 = scmp.lt.u32.totalorder %s262_s13, %s401_s0 }
   0x6   :  { %p268_p2 = pnand %p266_p1, %p263_p0 }
   0x8   :  { %271 = shalt.err (!%p268_p2)
}
   0x9   :  { %s272_s18 = scalar_lea.vmem %s16_s10, 128  ;;  %p277_p4 = scmp.lt.s32.totalorder %s16_s10, %s16_s10 }
   0xa   :  { %p273_p3 = scmp.ne.s32.totalorder %s16_s10, %s272_s18  ;;  %p278_p5 = scmp.lt.s32.totalorder %s272_s18, %s272_s18 }
   0xc   :  { %p279_p6 = por %p278_p5, %p277_p4 }
   0xe   :  { %p280_p7 = pnand %p279_p6, %p273_p3 }
  0x10   :  { %283 = shalt.err (!%p280_p7)
}
  0x11   :  { %s335_s19 = smov 64   ;;  %s336_s20 = smov 4  }
  0x12   :  { %21 = dma.hbm_to_vmem [thread:$0]  %s401_s0, 128, %s16_s10, [#allocation4], %s335_s19, %s335_s19, %s336_s20  }
  0x13   :  { %s337_s23 = smov [#allocation6]   ;;  %s284_s27 = scalar_lea.hbm %s402_s1, 1024 }
  0x14   :  { %s27_s24 = sshll.u32 %s337_s23, 4  ;;  %p285_p8 = scmp.ne.s32.totalorder %s402_s1, %s284_s27  ;;  %s28_s24 = int_to_ptr.vmem [resolvable:$true] %s27_s24 }
  0x15   :  { %p288_p9 = scmp.lt.u32.totalorder %s284_s27, %s402_s1 }
  0x17   :  { %p290_p10 = pnand %p288_p9, %p285_p8 }
  0x19   :  { %293 = shalt.err (!%p290_p10)
}
  0x1a   :  { %s294_s4 = scalar_lea.vmem %s28_s24, 1024  ;;  %p299_p12 = scmp.lt.s32.totalorder %s28_s24, %s28_s24 }
  0x1b   :  { %p295_p11 = scmp.ne.s32.totalorder %s28_s24, %s294_s4  ;;  %p300_p13 = scmp.lt.s32.totalorder %s294_s4, %s294_s4 }
  0x1d   :  { %p301_p0 = por %p300_p13, %p299_p12 }
  0x1f   :  { %p302_p1 = pnand %p301_p0, %p295_p11 }
  0x21   :  { %305 = shalt.err (!%p302_p1)
}
  0x22   :  { %33 = dma.hbm_to_vmem [thread:$0]  %s402_s1, 1024, %s28_s24, [#allocation7], %s335_s19, %s335_s19, %s336_s20  }
  0x23   :  { %328 = dma.done.wait [#allocation4], 128  }
  0x24   :  { %329 = vsyncadd [#allocation4], 4294967168 }
  0x25   :  { %330 = dma.done.wait [#allocation7], 1024  }
  0x26   :  { %331 = vsyncadd [#allocation7], 4294966272  ;;  %v338_v0 = vmov 0.0   ;;  %vm339_vm0 = vmmov 0   ;;  %v253_v1 = vld [vmem:[#allocation6] sm:$0xff]   ;;  %v254_v2 = vld [vmem:[#allocation6 + $0x8] sm:$0xff]  }
  0x27   :  { %226 = vmatprep.subr.bf16.mxu0 %v338_v0  ;;  %242 = vmatprep.mubr.msk.bf16.mxu0 %vm339_vm0, %v338_v0  ;;  %v255_v3 = vld [vmem:[#allocation6 + $0x10] sm:$0xff]   ;;  %v256_v4 = vld [vmem:[#allocation6 + $0x18] sm:$0xff]   ;;  %v257_v5 = vld [vmem:[#allocation6 + $0x20] sm:$0xff]   ;;  %s340_s1 = smov [#allocation8]  }
  0x28   :  { %227 = vmatpush3.bf16.msra.mxu0 %v253_v1  ;;  %v258_v6 = vld [vmem:[#allocation6 + $0x28] sm:$0xff]   ;;  %v259_v7 = vld [vmem:[#allocation6 + $0x30] sm:$0xff]   ;;  %v260_v8 = vld [vmem:[#allocation6 + $0x38] sm:$0xff]   ;;  %s186_s6 = sshll.u32 %s340_s1, 4  ;;  %s187_s6 = int_to_ptr.vmem [resolvable:$true] %s186_s6 }
  0x29   :  { %228 = vmatprep.subr.bf16.mxu0 %v338_v0  ;;  %v261_v9 = vld [vmem:[#allocation3] sm:$0xff]   ;;  %s306_s7 = scalar_lea.vmem %s187_s6, 128  ;;  %p311_p3 = scmp.lt.s32.totalorder %s187_s6, %s187_s6 }
  0x2a   :  { %p307_p2 = scmp.ne.s32.totalorder %s187_s6, %s306_s7  ;;  %p312_p4 = scmp.lt.s32.totalorder %s306_s7, %s306_s7 }
  0x2c   :  { %229 = vmatpush3.bf16.msra.mxu0 %v254_v2  ;;  %p313_p5 = por %p312_p4, %p311_p3 }
  0x2d   :  { %230 = vmatprep.subr.bf16.mxu0 %v338_v0 }
  0x2e   :  { %p314_p6 = pnand %p313_p5, %p307_p2 }
  0x30   :  { %231 = vmatpush3.bf16.msra.mxu0 %v255_v3 }
  0x31   :  { %232 = vmatprep.subr.bf16.mxu0 %v338_v0 }
  0x34   :  { %233 = vmatpush3.bf16.msra.mxu0 %v256_v4 }
  0x35   :  { %234 = vmatprep.subr.bf16.mxu0 %v338_v0 }
  0x38   :  { %235 = vmatpush3.bf16.msra.mxu0 %v257_v5 }
  0x39   :  { %236 = vmatprep.subr.bf16.mxu0 %v338_v0 }
  0x3c   :  { %237 = vmatpush3.bf16.msra.mxu0 %v258_v6 }
  0x3d   :  { %238 = vmatprep.subr.bf16.mxu0 %v338_v0 }
  0x40   :  { %239 = vmatpush3.bf16.msra.mxu0 %v259_v7 }
  0x41   :  { %240 = vmatprep.subr.bf16.mxu0 %v338_v0 }
  0x44   :  { %241 = vmatpush3.bf16.msra.mxu0 %v260_v8 }
  0x47   :  { %243 = vmatmul.mubr.bf16.vlgmr.msra.gmra.mrb[0].mxu0 %v261_v9 }
 0x11a   :  { %v155_v10 = vpop.f32.mrb[0].mxu0 }
 0x11b   :  { %v244_v11 = vpop.f32.mrb[1].mxu0 }
 0x11c   :  { %v158_v12 = vpop.f32.mrb[2].mxu0 }
 0x11d   :  { %v215_v13 = vpack.c.bf16 %v158_v12, %v155_v10  ;;  %v245_v14 = vpop.f32.mrb[3].mxu0 }
 0x11f   :  { %216 = vst [vmem:[#allocation8] sm:$0xff] %v215_v13  }
 0x120   :  { %317 = shalt.err (!%p314_p6)
}
 0x121   :  { %s318_s10 = scalar_lea.hbm %s403_s2, 128 }
 0x122   :  { %p319_p7 = scmp.ne.s32.totalorder %s403_s2, %s318_s10  ;;  %p322_p8 = scmp.lt.u32.totalorder %s318_s10, %s403_s2 }
 0x124   :  { %p324_p9 = pnand %p322_p8, %p319_p7 }
 0x126   :  { %327 = shalt.err (!%p324_p9)
}
 0x127   :  { %192 = dma.vmem_to_hbm [thread:$0]  %s187_s6, 128, %s403_s2, [#allocation5], %s335_s19, %s335_s19, %s336_s20  }
 0x128   :  { %332 = dma.done.wait [#allocation5], 128  }
 0x129   :  { %333 = vsyncadd [#allocation5], 4294967168 }
 0x12a   :  { %196 = vsyncpa [#allocation4], 1 }
 0x12b   :  { %197 = vsyncpa [#allocation7], 1 }
 0x12c   :  { %198 = vsyncpa [#allocation5], 1 }

</bundles_post_ra>
